<compile_context>
chip_gen: v7x
topology: tpu7x:2x2x1
jax: 0.10.0
libtpu: 0.0.40
codegen_flags: <defaults>
</compile_context>

<pallas_src>
import jax
import jax.numpy as jnp
from jax.experimental import pallas as pl
from jax.experimental.pallas import tpu as pltpu

LANE = 128
SUBLANE_BF16 = 16  # bf16 packs 16 rows per vreg sublane group


def _round_up(x, m):
    return ((x + m - 1) // m) * m


def mlp_adult_kernel(x_ref,
                     w1_ref, b1_ref,
                     w2_ref, b2_ref,
                     w3_ref, b3_ref,
                     w4_ref, b4_ref,
                     w5_ref, b5_ref,
                     o_ref):
    def hidden(h, w_ref, b_ref):
        # bf16 operands on the MXU, f32 accumulation; bias add + ReLU in f32,
        # then cast back to bf16 (identical to casting just before the next dot,
        # but halves the live intermediate footprint).
        y = jnp.dot(h, w_ref[...], preferred_element_type=jnp.float32) + b_ref[...]
        return jnp.maximum(y, 0.0).astype(jnp.bfloat16)

    h = x_ref[...]                                   # bf16 [TB, D_in_p]
    h = hidden(h, w1_ref, b1_ref)
    h = hidden(h, w2_ref, b2_ref)
    h = hidden(h, w3_ref, b3_ref)
    h = hidden(h, w4_ref, b4_ref)
    y = jnp.dot(h, w5_ref[...], preferred_element_type=jnp.float32) + b5_ref[...]
    o_ref[...] = jax.nn.sigmoid(y)                   # f32 [TB, D_out_p], EUP


def mlp_adult_forward(x, params, *, block_batch=2048):
    """x: [B, D_in] f32; params: list of (W [in, out], b [1, out] or [out]) for 5 layers."""
    B, D_in = x.shape
    D_out = params[-1][0].shape[1]
    n_layers = len(params)

    # --- pad / cast weights and biases --------------------------------------
    # Hidden dims -> 128 lanes (MXU/lane friendly); final output dim -> only 8
    # (block covers the full width, so writeback DMA stays contiguous);
    # input dim -> multiple of 16 only (bf16 sublane packing), NOT 128.
    D_in_p = _round_up(D_in, SUBLANE_BF16)
    dims_p = [D_in_p]
    flat = []
    for li, (w, b) in enumerate(params):
        di, do = w.shape
        di_p = dims_p[-1]
        do_p = _round_up(do, 8) if li == n_layers - 1 else _round_up(do, LANE)
        wp = jnp.zeros((di_p, do_p), jnp.bfloat16).at[:di, :do].set(
            w.astype(jnp.bfloat16))
        bp = jnp.zeros((1, do_p), jnp.float32).at[:, :do].set(
            jnp.reshape(b, (1, -1)).astype(jnp.float32))
        flat += [wp, bp]
        dims_p.append(do_p)
    D_out_p = dims_p[-1]

    # --- batch tiling ---------------------------------------------------------
    B_align = _round_up(B, SUBLANE_BF16)
    if B_align <= SUBLANE_BF16:
        TB = B_align                                  # tiny batch: single step
    else:
        # Multiple of 16, capped by block_batch, and >= 2 grid steps so the
        # "parallel" batch axis can shard across v7x's two TensorCores.
        TB = min(_round_up(block_batch, SUBLANE_BF16),
                 _round_up(pl.cdiv(B_align, 2), SUBLANE_BF16))
    B_p = _round_up(B_align, TB)
    grid = (B_p // TB,)

    # Input streamed as bf16, no lane padding (block last dim == full array dim).
    x_p = jnp.zeros((B_p, D_in_p), jnp.bfloat16).at[:B, :D_in].set(
        x.astype(jnp.bfloat16))

    x_spec = pl.BlockSpec((TB, D_in_p), lambda i: (i, 0))
    out_spec = pl.BlockSpec((TB, D_out_p), lambda i: (i, 0))

    # --- VMEM budget (explicitly raise v5e's 16 MiB default scoped VMEM) -----
    param_bytes = sum(int(a.size) * a.dtype.itemsize for a in flat)
    tile_io_bytes = 2 * TB * D_in_p * 2 + 2 * TB * D_out_p * 4   # double-buffered IO
    inter_bytes = 8 * TB * LANE * 4                               # inter-layer headroom
    vmem_limit = int(max(32 << 20,
                         min(64 << 20,
                             2 * param_bytes + tile_io_bytes + inter_bytes + (4 << 20))))

    # --- advisory cost estimate (post-layout-change traffic) ------------------
    flops = 2 * B_p * sum(a * b for a, b in zip(dims_p[:-1], dims_p[1:]))
    bytes_accessed = (int(x_p.size) * 2 + B_p * D_out_p * 4 + param_bytes)
    cost = pl.CostEstimate(flops=flops, transcendentals=B_p * D_out_p,
                           bytes_accessed=bytes_accessed)

    def _call(single_buffer_params):
        if single_buffer_params:
            # Weights/biases have a constant index_map; one VMEM buffer is enough.
            pspecs = [pl.BlockSpec(a.shape, lambda i: (0, 0),
                                   pipeline_mode=pl.Buffered(1)) for a in flat]
        else:
            pspecs = [pl.BlockSpec(a.shape, lambda i: (0, 0)) for a in flat]
        return pl.pallas_call(
            mlp_adult_kernel,
            out_shape=jax.ShapeDtypeStruct((B_p, D_out_p), jnp.float32),
            grid=grid,
            in_specs=[x_spec] + pspecs,
            out_specs=out_spec,
            compiler_params=pltpu.CompilerParams(
                dimension_semantics=("parallel",),    # shard batch over v7x's 2 TCs
                vmem_limit_bytes=vmem_limit),
            cost_estimate=cost,
        )(x_p, *flat)

    try:
        y_p = _call(True)
    except Exception:
        # Fallback if single-buffered pipeline_mode is unsupported on this jax build.
        y_p = _call(False)
    return y_p[:B, :D_out]


def init_params(key, dims):
    """PyTorch nn.Linear-style uniform(-1/sqrt(fan_in), 1/sqrt(fan_in)) init."""
    params = []
    for d_in, d_out in zip(dims[:-1], dims[1:]):
        key, kw, kb = jax.random.split(key, 3)
        bound = 1.0 / jnp.sqrt(jnp.float32(d_in))
        w = jax.random.uniform(kw, (d_in, d_out), jnp.float32, -bound, bound)
        b = jax.random.uniform(kb, (1, d_out), jnp.float32, -bound, bound)
        params.append((w, b))
    return params


def reference_forward(x, params):
    h = x
    for i, (w, b) in enumerate(params):
        h = h @ w + jnp.reshape(b, (1, -1))
        h = jnp.maximum(h, 0.0) if i < len(params) - 1 else jax.nn.sigmoid(h)
    return h


if __name__ == "__main__":
    # Small shapes consistent with MLP_Adult(D_in, H1, H2, H3, H4, D_out)
    B, D_in, H1, H2, H3, H4, D_out = 8, 32, 64, 64, 32, 16, 2
    key = jax.random.PRNGKey(0)
    key, kx = jax.random.split(key)
    x = jax.random.normal(kx, (B, D_in), jnp.float32)
    params = init_params(key, (D_in, H1, H2, H3, H4, D_out))

    y = jax.block_until_ready(mlp_adult_forward(x, params))
    y_ref = reference_forward(x, params)
    assert y.shape == (B, D_out)
    # bf16 matmul operands (f32 accumulation) vs a pure-f32 reference.
    assert jnp.allclose(y, y_ref, atol=1e-2, rtol=0.0), float(jnp.max(jnp.abs(y - y_ref)))

    # Exercise multi-step grid + ragged batch padding (B not a multiple of the tile).
    B2 = 20
    key, kx2 = jax.random.split(key)
    x2 = jax.random.normal(kx2, (B2, D_in), jnp.float32)
    y2 = jax.block_until_ready(mlp_adult_forward(x2, params, block_batch=16))
    y2_ref = reference_forward(x2, params)
    assert y2.shape == (B2, D_out)
    assert jnp.allclose(y2, y2_ref, atol=1e-2, rtol=0.0)

    print("KERNEL_OK")
</pallas_src>

<mosaic_0001>
module attributes {stable_mosaic.version = 11 : i64} {
  func.func @mlp_adult_kernel(%arg0: i32, %arg1: memref<16x32xbf16, #tpu.memory_space<vmem>>, %arg2: memref<32x128xbf16, #tpu.memory_space<vmem>>, %arg3: memref<1x128xf32, #tpu.memory_space<vmem>>, %arg4: memref<128x128xbf16, #tpu.memory_space<vmem>>, %arg5: memref<1x128xf32, #tpu.memory_space<vmem>>, %arg6: memref<128x128xbf16, #tpu.memory_space<vmem>>, %arg7: memref<1x128xf32, #tpu.memory_space<vmem>>, %arg8: memref<128x128xbf16, #tpu.memory_space<vmem>>, %arg9: memref<1x128xf32, #tpu.memory_space<vmem>>, %arg10: memref<128x8xbf16, #tpu.memory_space<vmem>>, %arg11: memref<1x8xf32, #tpu.memory_space<vmem>>, %arg12: memref<16x8xf32, #tpu.memory_space<vmem>>) attributes {dimension_semantics = [#tpu.dimension_semantics<parallel>], iteration_bounds = array<i64: 1>, scalar_prefetch = 0 : i64, scratch_operands = 0 : i64, tpu.core_type = #tpu.core_type<tc>, window_params = [{transform_indices = @transform_0, window_bounds = array<i64: 16, 32>}, {pipeline_mode = #tpu.pipeline_mode<synchronous>, transform_indices = @transform_1, window_bounds = array<i64: 32, 128>}, {pipeline_mode = #tpu.pipeline_mode<synchronous>, transform_indices = @transform_2, window_bounds = array<i64: 1, 128>}, {pipeline_mode = #tpu.pipeline_mode<synchronous>, transform_indices = @transform_3, window_bounds = array<i64: 128, 128>}, {pipeline_mode = #tpu.pipeline_mode<synchronous>, transform_indices = @transform_4, window_bounds = array<i64: 1, 128>}, {pipeline_mode = #tpu.pipeline_mode<synchronous>, transform_indices = @transform_5, window_bounds = array<i64: 128, 128>}, {pipeline_mode = #tpu.pipeline_mode<synchronous>, transform_indices = @transform_6, window_bounds = array<i64: 1, 128>}, {pipeline_mode = #tpu.pipeline_mode<synchronous>, transform_indices = @transform_7, window_bounds = array<i64: 128, 128>}, {pipeline_mode = #tpu.pipeline_mode<synchronous>, transform_indices = @transform_8, window_bounds = array<i64: 1, 128>}, {pipeline_mode = #tpu.pipeline_mode<synchronous>, transform_indices = @transform_9, window_bounds = array<i64: 128, 8>}, {pipeline_mode = #tpu.pipeline_mode<synchronous>, transform_indices = @transform_10, window_bounds = array<i64: 1, 8>}, {transform_indices = @transform_11, window_bounds = array<i64: 16, 8>}]} {
    %c0 = arith.constant 0 : index
    %c0_0 = arith.constant 0 : index
    %0 = vector.load %arg1[%c0, %c0_0] : memref<16x32xbf16, #tpu.memory_space<vmem>>, vector<16x32xbf16>
    %c0_1 = arith.constant 0 : index
    %c0_2 = arith.constant 0 : index
    %1 = vector.load %arg2[%c0_1, %c0_2] : memref<32x128xbf16, #tpu.memory_space<vmem>>, vector<32x128xbf16>
    %cst = arith.constant dense<0.000000e+00> : vector<16x128xf32>
    %2 = tpu.matmul %0, %1, %cst {dimension_numbers = #tpu.dot_dimension_numbers<[1], [0], [0], [1], [0, 0, 1, 1], [], []>} : vector<16x32xbf16>, vector<32x128xbf16>, vector<16x128xf32> -> vector<16x128xf32>
    %c0_3 = arith.constant 0 : index
    %c0_4 = arith.constant 0 : index
    %3 = vector.load %arg3[%c0_3, %c0_4] : memref<1x128xf32, #tpu.memory_space<vmem>>, vector<1x128xf32>
    %4 = vector.broadcast %3 : vector<1x128xf32> to vector<16x128xf32>
    %5 = arith.addf %2, %4 : vector<16x128xf32>
    %cst_5 = arith.constant 0.000000e+00 : f32
    %6 = vector.broadcast %cst_5 : f32 to vector<16x128xf32>
    %7 = arith.maximumf %5, %6 : vector<16x128xf32>
    %8 = arith.truncf %7 : vector<16x128xf32> to vector<16x128xbf16>
    %c0_6 = arith.constant 0 : index
    %c0_7 = arith.constant 0 : index
    %9 = vector.load %arg4[%c0_6, %c0_7] : memref<128x128xbf16, #tpu.memory_space<vmem>>, vector<128x128xbf16>
    %cst_8 = arith.constant dense<0.000000e+00> : vector<16x128xf32>
    %10 = tpu.matmul %8, %9, %cst_8 {dimension_numbers = #tpu.dot_dimension_numbers<[1], [0], [0], [1], [0, 0, 1, 1], [], []>} : vector<16x128xbf16>, vector<128x128xbf16>, vector<16x128xf32> -> vector<16x128xf32>
    %c0_9 = arith.constant 0 : index
    %c0_10 = arith.constant 0 : index
    %11 = vector.load %arg5[%c0_9, %c0_10] : memref<1x128xf32, #tpu.memory_space<vmem>>, vector<1x128xf32>
    %12 = vector.broadcast %11 : vector<1x128xf32> to vector<16x128xf32>
    %13 = arith.addf %10, %12 : vector<16x128xf32>
    %cst_11 = arith.constant 0.000000e+00 : f32
    %14 = vector.broadcast %cst_11 : f32 to vector<16x128xf32>
    %15 = arith.maximumf %13, %14 : vector<16x128xf32>
    %16 = arith.truncf %15 : vector<16x128xf32> to vector<16x128xbf16>
    %c0_12 = arith.constant 0 : index
    %c0_13 = arith.constant 0 : index
    %17 = vector.load %arg6[%c0_12, %c0_13] : memref<128x128xbf16, #tpu.memory_space<vmem>>, vector<128x128xbf16>
    %cst_14 = arith.constant dense<0.000000e+00> : vector<16x128xf32>
    %18 = tpu.matmul %16, %17, %cst_14 {dimension_numbers = #tpu.dot_dimension_numbers<[1], [0], [0], [1], [0, 0, 1, 1], [], []>} : vector<16x128xbf16>, vector<128x128xbf16>, vector<16x128xf32> -> vector<16x128xf32>
    %c0_15 = arith.constant 0 : index
    %c0_16 = arith.constant 0 : index
    %19 = vector.load %arg7[%c0_15, %c0_16] : memref<1x128xf32, #tpu.memory_space<vmem>>, vector<1x128xf32>
    %20 = vector.broadcast %19 : vector<1x128xf32> to vector<16x128xf32>
    %21 = arith.addf %18, %20 : vector<16x128xf32>
    %cst_17 = arith.constant 0.000000e+00 : f32
    %22 = vector.broadcast %cst_17 : f32 to vector<16x128xf32>
    %23 = arith.maximumf %21, %22 : vector<16x128xf32>
    %24 = arith.truncf %23 : vector<16x128xf32> to vector<16x128xbf16>
    %c0_18 = arith.constant 0 : index
    %c0_19 = arith.constant 0 : index
    %25 = vector.load %arg8[%c0_18, %c0_19] : memref<128x128xbf16, #tpu.memory_space<vmem>>, vector<128x128xbf16>
    %cst_20 = arith.constant dense<0.000000e+00> : vector<16x128xf32>
    %26 = tpu.matmul %24, %25, %cst_20 {dimension_numbers = #tpu.dot_dimension_numbers<[1], [0], [0], [1], [0, 0, 1, 1], [], []>} : vector<16x128xbf16>, vector<128x128xbf16>, vector<16x128xf32> -> vector<16x128xf32>
    %c0_21 = arith.constant 0 : index
    %c0_22 = arith.constant 0 : index
    %27 = vector.load %arg9[%c0_21, %c0_22] : memref<1x128xf32, #tpu.memory_space<vmem>>, vector<1x128xf32>
    %28 = vector.broadcast %27 : vector<1x128xf32> to vector<16x128xf32>
    %29 = arith.addf %26, %28 : vector<16x128xf32>
    %cst_23 = arith.constant 0.000000e+00 : f32
    %30 = vector.broadcast %cst_23 : f32 to vector<16x128xf32>
    %31 = arith.maximumf %29, %30 : vector<16x128xf32>
    %32 = arith.truncf %31 : vector<16x128xf32> to vector<16x128xbf16>
    %c0_24 = arith.constant 0 : index
    %c0_25 = arith.constant 0 : index
    %33 = vector.load %arg10[%c0_24, %c0_25] : memref<128x8xbf16, #tpu.memory_space<vmem>>, vector<128x8xbf16>
    %cst_26 = arith.constant dense<0.000000e+00> : vector<16x8xf32>
    %34 = tpu.matmul %32, %33, %cst_26 {dimension_numbers = #tpu.dot_dimension_numbers<[1], [0], [0], [1], [0, 0, 1, 1], [], []>} : vector<16x128xbf16>, vector<128x8xbf16>, vector<16x8xf32> -> vector<16x8xf32>
    %c0_27 = arith.constant 0 : index
    %c0_28 = arith.constant 0 : index
    %35 = vector.load %arg11[%c0_27, %c0_28] : memref<1x8xf32, #tpu.memory_space<vmem>>, vector<1x8xf32>
    %36 = vector.broadcast %35 : vector<1x8xf32> to vector<16x8xf32>
    %37 = arith.addf %34, %36 : vector<16x8xf32>
    %38 = arith.negf %37 : vector<16x8xf32>
    %39 = math.exp %38 : vector<16x8xf32>
    %cst_29 = arith.constant 1.000000e+00 : f32
    %40 = vector.broadcast %cst_29 : f32 to vector<16x8xf32>
    %41 = arith.addf %40, %39 : vector<16x8xf32>
    %42 = arith.divf %40, %41 : vector<16x8xf32>
    %c0_30 = arith.constant 0 : index
    %c0_31 = arith.constant 0 : index
    %43 = vector.load %arg12[%c0_30, %c0_31] : memref<16x8xf32, #tpu.memory_space<vmem>>, vector<16x8xf32>
    tpu.vector_store %arg12[%c0_30, %c0_31], %42 {strides = array<i32>} : memref<16x8xf32, #tpu.memory_space<vmem>>, vector<16x8xf32>,
    return
  }
  func.func @transform_0(%arg0: i32) -> (i32, i32) {
    %c0_i32 = arith.constant 0 : i32
    %c0_i32_0 = arith.constant 0 : i32
    return %arg0, %c0_i32 : i32, i32
  }
  func.func @transform_1(%arg0: i32) -> (i32, i32) {
    %c0_i32 = arith.constant 0 : i32
    %c0_i32_0 = arith.constant 0 : i32
    %c0_i32_1 = arith.constant 0 : i32
    return %c0_i32, %c0_i32_0 : i32, i32
  }
  func.func @transform_2(%arg0: i32) -> (i32, i32) {
    %c0_i32 = arith.constant 0 : i32
    %c0_i32_0 = arith.constant 0 : i32
    %c0_i32_1 = arith.constant 0 : i32
    return %c0_i32, %c0_i32_0 : i32, i32
  }
  func.func @transform_3(%arg0: i32) -> (i32, i32) {
    %c0_i32 = arith.constant 0 : i32
    %c0_i32_0 = arith.constant 0 : i32
    %c0_i32_1 = arith.constant 0 : i32
    return %c0_i32, %c0_i32_0 : i32, i32
  }
  func.func @transform_4(%arg0: i32) -> (i32, i32) {
    %c0_i32 = arith.constant 0 : i32
    %c0_i32_0 = arith.constant 0 : i32
    %c0_i32_1 = arith.constant 0 : i32
    return %c0_i32, %c0_i32_0 : i32, i32
  }
  func.func @transform_5(%arg0: i32) -> (i32, i32) {
    %c0_i32 = arith.constant 0 : i32
    %c0_i32_0 = arith.constant 0 : i32
    %c0_i32_1 = arith.constant 0 : i32
    return %c0_i32, %c0_i32_0 : i32, i32
  }
  func.func @transform_6(%arg0: i32) -> (i32, i32) {
    %c0_i32 = arith.constant 0 : i32
    %c0_i32_0 = arith.constant 0 : i32
    %c0_i32_1 = arith.constant 0 : i32
    return %c0_i32, %c0_i32_0 : i32, i32
  }
  func.func @transform_7(%arg0: i32) -> (i32, i32) {
    %c0_i32 = arith.constant 0 : i32
    %c0_i32_0 = arith.constant 0 : i32
    %c0_i32_1 = arith.constant 0 : i32
    return %c0_i32, %c0_i32_0 : i32, i32
  }
  func.func @transform_8(%arg0: i32) -> (i32, i32) {
    %c0_i32 = arith.constant 0 : i32
    %c0_i32_0 = arith.constant 0 : i32
    %c0_i32_1 = arith.constant 0 : i32
    return %c0_i32, %c0_i32_0 : i32, i32
  }
  func.func @transform_9(%arg0: i32) -> (i32, i32) {
    %c0_i32 = arith.constant 0 : i32
    %c0_i32_0 = arith.constant 0 : i32
    %c0_i32_1 = arith.constant 0 : i32
    return %c0_i32, %c0_i32_0 : i32, i32
  }
  func.func @transform_10(%arg0: i32) -> (i32, i32) {
    %c0_i32 = arith.constant 0 : i32
    %c0_i32_0 = arith.constant 0 : i32
    %c0_i32_1 = arith.constant 0 : i32
    return %c0_i32, %c0_i32_0 : i32, i32
  }
  func.func @transform_11(%arg0: i32) -> (i32, i32) {
    %c0_i32 = arith.constant 0 : i32
    %c0_i32_0 = arith.constant 0 : i32
    return %arg0, %c0_i32 : i32, i32
  }
}

module attributes {stable_mosaic.version = 11 : i64} {
  func.func @mlp_adult_kernel(%arg0: i32, %arg1: memref<16x32xbf16, #tpu.memory_space<vmem>>, %arg2: memref<32x128xbf16, #tpu.memory_space<vmem>>, %arg3: memref<1x128xf32, #tpu.memory_space<vmem>>, %arg4: memref<128x128xbf16, #tpu.memory_space<vmem>>, %arg5: memref<1x128xf32, #tpu.memory_space<vmem>>, %arg6: memref<128x128xbf16, #tpu.memory_space<vmem>>, %arg7: memref<1x128xf32, #tpu.memory_space<vmem>>, %arg8: memref<128x128xbf16, #tpu.memory_space<vmem>>, %arg9: memref<1x128xf32, #tpu.memory_space<vmem>>, %arg10: memref<128x8xbf16, #tpu.memory_space<vmem>>, %arg11: memref<1x8xf32, #tpu.memory_space<vmem>>, %arg12: memref<16x8xf32, #tpu.memory_space<vmem>>) attributes {dimension_semantics = [#tpu.dimension_semantics<parallel>], iteration_bounds = array<i64: 1>, scalar_prefetch = 0 : i64, scratch_operands = 0 : i64, tpu.core_type = #tpu.core_type<tc>, window_params = [{transform_indices = @transform_0, window_bounds = array<i64: 16, 32>}, {pipeline_mode = #tpu.pipeline_mode<synchronous>, transform_indices = @transform_1, window_bounds = array<i64: 32, 128>}, {pipeline_mode = #tpu.pipeline_mode<synchronous>, transform_indices = @transform_2, window_bounds = array<i64: 1, 128>}, {pipeline_mode = #tpu.pipeline_mode<synchronous>, transform_indices = @transform_3, window_bounds = array<i64: 128, 128>}, {pipeline_mode = #tpu.pipeline_mode<synchronous>, transform_indices = @transform_4, window_bounds = array<i64: 1, 128>}, {pipeline_mode = #tpu.pipeline_mode<synchronous>, transform_indices = @transform_5, window_bounds = array<i64: 128, 128>}, {pipeline_mode = #tpu.pipeline_mode<synchronous>, transform_indices = @transform_6, window_bounds = array<i64: 1, 128>}, {pipeline_mode = #tpu.pipeline_mode<synchronous>, transform_indices = @transform_7, window_bounds = array<i64: 128, 128>}, {pipeline_mode = #tpu.pipeline_mode<synchronous>, transform_indices = @transform_8, window_bounds = array<i64: 1, 128>}, {pipeline_mode = #tpu.pipeline_mode<synchronous>, transform_indices = @transform_9, window_bounds = array<i64: 128, 8>}, {pipeline_mode = #tpu.pipeline_mode<synchronous>, transform_indices = @transform_10, window_bounds = array<i64: 1, 8>}, {transform_indices = @transform_11, window_bounds = array<i64: 16, 8>}]} {
    %c0 = arith.constant 0 : index
    %c0_0 = arith.constant 0 : index
    %0 = vector.load %arg1[%c0, %c0_0] : memref<16x32xbf16, #tpu.memory_space<vmem>>, vector<16x32xbf16>
    %c0_1 = arith.constant 0 : index
    %c0_2 = arith.constant 0 : index
    %1 = vector.load %arg2[%c0_1, %c0_2] : memref<32x128xbf16, #tpu.memory_space<vmem>>, vector<32x128xbf16>
    %cst = arith.constant dense<0.000000e+00> : vector<16x128xf32>
    %2 = tpu.matmul %0, %1, %cst {dimension_numbers = #tpu.dot_dimension_numbers<[1], [0], [0], [1], [0, 0, 1, 1], [], []>} : vector<16x32xbf16>, vector<32x128xbf16>, vector<16x128xf32> -> vector<16x128xf32>
    %c0_3 = arith.constant 0 : index
    %c0_4 = arith.constant 0 : index
    %3 = vector.load %arg3[%c0_3, %c0_4] : memref<1x128xf32, #tpu.memory_space<vmem>>, vector<1x128xf32>
    %4 = vector.broadcast %3 : vector<1x128xf32> to vector<16x128xf32>
    %5 = arith.addf %2, %4 : vector<16x128xf32>
    %cst_5 = arith.constant 0.000000e+00 : f32
    %6 = vector.broadcast %cst_5 : f32 to vector<16x128xf32>
    %7 = arith.maximumf %5, %6 : vector<16x128xf32>
    %8 = arith.truncf %7 : vector<16x128xf32> to vector<16x128xbf16>
    %c0_6 = arith.constant 0 : index
    %c0_7 = arith.constant 0 : index
    %9 = vector.load %arg4[%c0_6, %c0_7] : memref<128x128xbf16, #tpu.memory_space<vmem>>, vector<128x128xbf16>
    %cst_8 = arith.constant dense<0.000000e+00> : vector<16x128xf32>
    %10 = tpu.matmul %8, %9, %cst_8 {dimension_numbers = #tpu.dot_dimension_numbers<[1], [0], [0], [1], [0, 0, 1, 1], [], []>} : vector<16x128xbf16>, vector<128x128xbf16>, vector<16x128xf32> -> vector<16x128xf32>
    %c0_9 = arith.constant 0 : index
    %c0_10 = arith.constant 0 : index
    %11 = vector.load %arg5[%c0_9, %c0_10] : memref<1x128xf32, #tpu.memory_space<vmem>>, vector<1x128xf32>
    %12 = vector.broadcast %11 : vector<1x128xf32> to vector<16x128xf32>
    %13 = arith.addf %10, %12 : vector<16x128xf32>
    %cst_11 = arith.constant 0.000000e+00 : f32
    %14 = vector.broadcast %cst_11 : f32 to vector<16x128xf32>
    %15 = arith.maximumf %13, %14 : vector<16x128xf32>
    %16 = arith.truncf %15 : vector<16x128xf32> to vector<16x128xbf16>
    %c0_12 = arith.constant 0 : index
    %c0_13 = arith.constant 0 : index
    %17 = vector.load %arg6[%c0_12, %c0_13] : memref<128x128xbf16, #tpu.memory_space<vmem>>, vector<128x128xbf16>
    %cst_14 = arith.constant dense<0.000000e+00> : vector<16x128xf32>
    %18 = tpu.matmul %16, %17, %cst_14 {dimension_numbers = #tpu.dot_dimension_numbers<[1], [0], [0], [1], [0, 0, 1, 1], [], []>} : vector<16x128xbf16>, vector<128x128xbf16>, vector<16x128xf32> -> vector<16x128xf32>
    %c0_15 = arith.constant 0 : index
    %c0_16 = arith.constant 0 : index
    %19 = vector.load %arg7[%c0_15, %c0_16] : memref<1x128xf32, #tpu.memory_space<vmem>>, vector<1x128xf32>
    %20 = vector.broadcast %19 : vector<1x128xf32> to vector<16x128xf32>
    %21 = arith.addf %18, %20 : vector<16x128xf32>
    %cst_17 = arith.constant 0.000000e+00 : f32
    %22 = vector.broadcast %cst_17 : f32 to vector<16x128xf32>
    %23 = arith.maximumf %21, %22 : vector<16x128xf32>
    %24 = arith.truncf %23 : vector<16x128xf32> to vector<16x128xbf16>
    %c0_18 = arith.constant 0 : index
    %c0_19 = arith.constant 0 : index
    %25 = vector.load %arg8[%c0_18, %c0_19] : memref<128x128xbf16, #tpu.memory_space<vmem>>, vector<128x128xbf16>
    %cst_20 = arith.constant dense<0.000000e+00> : vector<16x128xf32>
    %26 = tpu.matmul %24, %25, %cst_20 {dimension_numbers = #tpu.dot_dimension_numbers<[1], [0], [0], [1], [0, 0, 1, 1], [], []>} : vector<16x128xbf16>, vector<128x128xbf16>, vector<16x128xf32> -> vector<16x128xf32>
    %c0_21 = arith.constant 0 : index
    %c0_22 = arith.constant 0 : index
    %27 = vector.load %arg9[%c0_21, %c0_22] : memref<1x128xf32, #tpu.memory_space<vmem>>, vector<1x128xf32>
    %28 = vector.broadcast %27 : vector<1x128xf32> to vector<16x128xf32>
    %29 = arith.addf %26, %28 : vector<16x128xf32>
    %cst_23 = arith.constant 0.000000e+00 : f32
    %30 = vector.broadcast %cst_23 : f32 to vector<16x128xf32>
    %31 = arith.maximumf %29, %30 : vector<16x128xf32>
    %32 = arith.truncf %31 : vector<16x128xf32> to vector<16x128xbf16>
    %c0_24 = arith.constant 0 : index
    %c0_25 = arith.constant 0 : index
    %33 = vector.load %arg10[%c0_24, %c0_25] : memref<128x8xbf16, #tpu.memory_space<vmem>>, vector<128x8xbf16>
    %cst_26 = arith.constant dense<0.000000e+00> : vector<16x8xf32>
    %34 = tpu.matmul %32, %33, %cst_26 {dimension_numbers = #tpu.dot_dimension_numbers<[1], [0], [0], [1], [0, 0, 1, 1], [], []>} : vector<16x128xbf16>, vector<128x8xbf16>, vector<16x8xf32> -> vector<16x8xf32>
    %c0_27 = arith.constant 0 : index
    %c0_28 = arith.constant 0 : index
    %35 = vector.load %arg11[%c0_27, %c0_28] : memref<1x8xf32, #tpu.memory_space<vmem>>, vector<1x8xf32>
    %36 = vector.broadcast %35 : vector<1x8xf32> to vector<16x8xf32>
    %37 = arith.addf %34, %36 : vector<16x8xf32>
    %38 = arith.negf %37 : vector<16x8xf32>
    %39 = math.exp %38 : vector<16x8xf32>
    %cst_29 = arith.constant 1.000000e+00 : f32
    %40 = vector.broadcast %cst_29 : f32 to vector<16x8xf32>
    %41 = arith.addf %40, %39 : vector<16x8xf32>
    %42 = arith.divf %40, %41 : vector<16x8xf32>
    %c0_30 = arith.constant 0 : index
    %c0_31 = arith.constant 0 : index
    %43 = vector.load %arg12[%c0_30, %c0_31] : memref<16x8xf32, #tpu.memory_space<vmem>>, vector<16x8xf32>
    tpu.vector_store %arg12[%c0_30, %c0_31], %42 {strides = array<i32>} : memref<16x8xf32, #tpu.memory_space<vmem>>, vector<16x8xf32>,
    return
  }
  func.func @transform_0(%arg0: i32) -> (i32, i32) {
    %c0_i32 = arith.constant 0 : i32
    %c0_i32_0 = arith.constant 0 : i32
    return %arg0, %c0_i32 : i32, i32
  }
  func.func @transform_1(%arg0: i32) -> (i32, i32) {
    %c0_i32 = arith.constant 0 : i32
    %c0_i32_0 = arith.constant 0 : i32
    %c0_i32_1 = arith.constant 0 : i32
    return %c0_i32, %c0_i32_0 : i32, i32
  }
  func.func @transform_2(%arg0: i32) -> (i32, i32) {
    %c0_i32 = arith.constant 0 : i32
    %c0_i32_0 = arith.constant 0 : i32
    %c0_i32_1 = arith.constant 0 : i32
    return %c0_i32, %c0_i32_0 : i32, i32
  }
  func.func @transform_3(%arg0: i32) -> (i32, i32) {
    %c0_i32 = arith.constant 0 : i32
    %c0_i32_0 = arith.constant 0 : i32
    %c0_i32_1 = arith.constant 0 : i32
    return %c0_i32, %c0_i32_0 : i32, i32
  }
  func.func @transform_4(%arg0: i32) -> (i32, i32) {
    %c0_i32 = arith.constant 0 : i32
    %c0_i32_0 = arith.constant 0 : i32
    %c0_i32_1 = arith.constant 0 : i32
    return %c0_i32, %c0_i32_0 : i32, i32
  }
  func.func @transform_5(%arg0: i32) -> (i32, i32) {
    %c0_i32 = arith.constant 0 : i32
    %c0_i32_0 = arith.constant 0 : i32
    %c0_i32_1 = arith.constant 0 : i32
    return %c0_i32, %c0_i32_0 : i32, i32
  }
  func.func @transform_6(%arg0: i32) -> (i32, i32) {
    %c0_i32 = arith.constant 0 : i32
    %c0_i32_0 = arith.constant 0 : i32
    %c0_i32_1 = arith.constant 0 : i32
    return %c0_i32, %c0_i32_0 : i32, i32
  }
  func.func @transform_7(%arg0: i32) -> (i32, i32) {
    %c0_i32 = arith.constant 0 : i32
    %c0_i32_0 = arith.constant 0 : i32
    %c0_i32_1 = arith.constant 0 : i32
    return %c0_i32, %c0_i32_0 : i32, i32
  }
  func.func @transform_8(%arg0: i32) -> (i32, i32) {
    %c0_i32 = arith.constant 0 : i32
    %c0_i32_0 = arith.constant 0 : i32
    %c0_i32_1 = arith.constant 0 : i32
    return %c0_i32, %c0_i32_0 : i32, i32
  }
  func.func @transform_9(%arg0: i32) -> (i32, i32) {
    %c0_i32 = arith.constant 0 : i32
    %c0_i32_0 = arith.constant 0 : i32
    %c0_i32_1 = arith.constant 0 : i32
    return %c0_i32, %c0_i32_0 : i32, i32
  }
  func.func @transform_10(%arg0: i32) -> (i32, i32) {
    %c0_i32 = arith.constant 0 : i32
    %c0_i32_0 = arith.constant 0 : i32
    %c0_i32_1 = arith.constant 0 : i32
    return %c0_i32, %c0_i32_0 : i32, i32
  }
  func.func @transform_11(%arg0: i32) -> (i32, i32) {
    %c0_i32 = arith.constant 0 : i32
    %c0_i32_0 = arith.constant 0 : i32
    return %arg0, %c0_i32 : i32, i32
  }
}

</mosaic_0001>

<bundles_post_ra>
// kernel: tpu_custom_call.1
= control target key start
LH: loop header
LB: loop body
LE: loop exit
PB: predicated region body
PF: predicated region fallthrough
CT: control target
= control target key end

     0   :  { %16 = vsyncpa [#allocation3], 0  ;;  %s1161_s0 = inlined_call_operand.vmem [shape: bf16[16,32], index: 0, kind: input, shape index: {}]   ;;  %s1162_s1 = inlined_call_operand.hbm [shape: bf16[32,128], index: 1, kind: input, shape index: {}]   ;;  %s1163_s2 = inlined_call_operand.vmem [shape: f32[1,128], index: 2, kind: input, shape index: {}]   ;;  %s1164_s3 = inlined_call_operand.vmem [shape: bf16[128,128], index: 3, kind: input, shape index: {}]   ;;  %s1165_s4 = inlined_call_operand.vmem [shape: f32[1,128], index: 4, kind: input, shape index: {}]   ;;  %s1166_s5 = inlined_call_operand.hbm [shape: bf16[128,128], index: 5, kind: input, shape index: {}]   ;;  %s1167_s6 = inlined_call_operand.vmem [shape: f32[1,128], index: 6, kind: input, shape index: {}]   ;;  %s1168_s7 = inlined_call_operand.hbm [shape: bf16[128,128], index: 7, kind: input, shape index: {}]   ;;  %s1169_s8 = inlined_call_operand.vmem [shape: f32[1,128], index: 8, kind: input, shape index: {}]   ;;  %s1170_s9 = inlined_call_operand.vmem [shape: bf16[128,8], index: 9, kind: input, shape index: {}]   ;;  %s1171_s10 = inlined_call_operand.vmem [shape: f32[1,8], index: 10, kind: input, shape index: {}]   ;;  %s1172_s11 = inlined_call_operand.vmem [shape: f32[16,8], index: 11, kind: output, shape index: {}]  }
   0x1   :  { %17 = vsyncpa [#allocation5], 0  ;;  %s926_s17 = smov [#allocation4]   ;;  %s927_s19 = smov [#allocation2]  }
   0x2   :  { %s43_s18 = sshll.u32 %s926_s17, 4  ;;  %s25_s20 = sshll.u32 %s927_s19, 4  ;;  %s44_s18 = int_to_ptr.vmem [resolvable:$true] %s43_s18  ;;  %s993_s20 = int_to_ptr.vmem [resolvable:$true] %s25_s20 }
   0x3   :  { %s856_s23 = scalar_lea.hbm %s1166_s5, 1024 }
   0x4   :  { %p857_p0 = scmp.ne.s32.totalorder %s1166_s5, %s856_s23  ;;  %p860_p1 = scmp.lt.u32.totalorder %s856_s23, %s1166_s5 }
   0x6   :  { %p862_p2 = pnand %p860_p1, %p857_p0 }
   0x8   :  { %865 = shalt.err (!%p862_p2)
}
   0x9   :  { %s866_s28 = scalar_lea.vmem %s44_s18, 1024  ;;  %p871_p4 = scmp.lt.s32.totalorder %s44_s18, %s44_s18 }
   0xa   :  { %p867_p3 = scmp.ne.s32.totalorder %s44_s18, %s866_s28  ;;  %p872_p5 = scmp.lt.s32.totalorder %s866_s28, %s866_s28 }
   0xc   :  { %p873_p6 = por %p872_p5, %p871_p4 }
   0xe   :  { %p874_p7 = pnand %p873_p6, %p867_p3 }
  0x10   :  { %877 = shalt.err (!%p874_p7)
}
  0x11   :  { %s928_s29 = smov 64   ;;  %s929_s30 = smov 4  }
  0x12   :  { %49 = dma.hbm_to_vmem [thread:$0]  %s1166_s5, 1024, %s44_s18, [#allocation5], %s928_s29, %s928_s29, %s929_s30  }
  0x13   :  { %s878_s16 = scalar_lea.hbm %s1162_s1, 256 }
  0x14   :  { %p879_p8 = scmp.ne.s32.totalorder %s1162_s1, %s878_s16  ;;  %p882_p9 = scmp.lt.u32.totalorder %s878_s16, %s1162_s1 }
  0x16   :  { %p884_p10 = pnand %p882_p9, %p879_p8 }
  0x18   :  { %887 = shalt.err (!%p884_p10)
}
  0x19   :  { %s888_s23 = scalar_lea.vmem %s993_s20, 256  ;;  %p893_p12 = scmp.lt.s32.totalorder %s993_s20, %s993_s20 }
  0x1a   :  { %p889_p11 = scmp.ne.s32.totalorder %s993_s20, %s888_s23  ;;  %p894_p13 = scmp.lt.s32.totalorder %s888_s23, %s888_s23 }
  0x1c   :  { %p895_p0 = por %p894_p13, %p893_p12 }
  0x1e   :  { %p896_p1 = pnand %p895_p0, %p889_p11 }
  0x20   :  { %899 = shalt.err (!%p896_p1)
}
  0x21   :  { %31 = dma.hbm_to_vmem [thread:$0]  %s1162_s1, 256, %s993_s20, [#allocation3], %s928_s29, %s928_s29, %s929_s30  }
  0x22   :  { %s930_s24 = smov [#allocation6]   ;;  %s900_s28 = scalar_lea.hbm %s1168_s7, 1024 }
  0x23   :  { %s57_s25 = sshll.u32 %s930_s24, 4  ;;  %p901_p2 = scmp.ne.s32.totalorder %s1168_s7, %s900_s28  ;;  %s58_s25 = int_to_ptr.vmem [resolvable:$true] %s57_s25 }
  0x24   :  { %p904_p3 = scmp.lt.u32.totalorder %s900_s28, %s1168_s7 }
  0x26   :  { %p906_p4 = pnand %p904_p3, %p901_p2 }
  0x28   :  { %909 = shalt.err (!%p906_p4)
}
  0x29   :  { %s910_s16 = scalar_lea.vmem %s58_s25, 1024  ;;  %p915_p6 = scmp.lt.s32.totalorder %s58_s25, %s58_s25 }
  0x2a   :  { %p911_p5 = scmp.ne.s32.totalorder %s58_s25, %s910_s16  ;;  %p916_p7 = scmp.lt.s32.totalorder %s910_s16, %s910_s16 }
  0x2c   :  { %p917_p8 = por %p916_p7, %p915_p6 }
  0x2e   :  { %p918_p9 = pnand %p917_p8, %p911_p5 }
  0x30   :  { %921 = shalt.err (!%p918_p9)
}
  0x31   :  { %63 = dma.hbm_to_vmem [thread:$0]  %s1168_s7, 1024, %s58_s25, [#allocation5], %s928_s29, %s928_s29, %s929_s30  }
  0x32   :  { %922 = dma.done.wait [#allocation3], 256  }
  0x33   :  { %923 = vsyncadd [#allocation3], 4294967040 }
  0x34   :  { %924 = dma.done.wait [#allocation5], 2048  }
  0x35   :  { %925 = vsyncadd [#allocation5], 4294965248  ;;  %v931_v0 = vmov 0.0   ;;  %vm932_vm0 = vmmov 0   ;;  %v813_v1 = vld [vmem:[#allocation2] sm:$0xff]   ;;  %v814_v2 = vld [vmem:[#allocation2 + $0x8] sm:$0xff]  }
  0x36   :  { %718 = vmatprep.subr.bf16.mxu0 %v931_v0  ;;  %722 = vmatprep.mubr.msk.bf16.mxu0 %vm932_vm0, %v931_v0  ;;  %v816_v3 = vld [vmem:[%s1164_s3] sm:$0xff]   ;;  %v817_v5 = vld [vmem:[%s1164_s3 + $0x8] sm:$0xff]   ;;  %vm110_vm1 = vcmask 261120   ;;  %v818_v6 = vld [vmem:[%s1164_s3 + $0x10] sm:$0xff]   ;;  %vm627_vm2 = vcmask 64512  }
  0x37   :  { %726 = vmatprep.subr.bf16.mxu1 %v931_v0  ;;  %742 = vmatprep.mubr.msk.bf16.mxu1 %vm932_vm0, %v931_v0  ;;  %v815_v4 = vld [vmem:[%s1161_s0] sm:$0xff]   ;;  %v819_v7 = vld [vmem:[%s1164_s3 + $0x18] sm:$0xff]   ;;  %v821_v9 = vld [vmem:[%s1164_s3 + $0x28] sm:$0xff]  }
  0x38   :  { %719 = vmatpush3.bf16.msra.mxu0 %v813_v1  ;;  %727 = vmatpush3.bf16.msra.mxu1 %v816_v3  ;;  %v820_v8 = vld [vmem:[%s1164_s3 + $0x20] sm:$0xff]   ;;  %v822_v10 = vld [vmem:[%s1164_s3 + $0x30] sm:$0xff]   ;;  %v823_v11 = vld [vmem:[%s1164_s3 + $0x38] sm:$0xff]  }
  0x39   :  { %720 = vmatprep.subr.bf16.mxu0 %v931_v0  ;;  %728 = vmatprep.subr.bf16.mxu1 %v931_v0  ;;  %v824_v12 = vld [vmem:[#allocation4] sm:$0xff]   ;;  %v825_v13 = vld [vmem:[#allocation4 + $0x8] sm:$0xff]   ;;  %v826_v14 = vld [vmem:[#allocation4 + $0x10] sm:$0xff]  }
  0x3a   :  { %v827_v15 = vld [vmem:[#allocation4 + $0x18] sm:$0xff]   ;;  %v828_v16 = vld [vmem:[#allocation4 + $0x20] sm:$0xff]   ;;  %v829_v17 = vld [vmem:[#allocation4 + $0x28] sm:$0xff]  }
  0x3b   :  { %v636_v18 = vld [vmem:[%s1163_s2] ss:$0 sm:$0xff]  ;;  %v831_v29 = vld [vmem:[#allocation4 + $0x38] sm:$0xff]   ;;  %v832_v30 = vld [vmem:[#allocation6] sm:$0xff]  }
  0x3c   :  { %721 = vmatpush3.bf16.msra.mxu0 %v814_v2  ;;  %729 = vmatpush3.bf16.msra.mxu1 %v817_v5  ;;  %v830_v28 = vld [vmem:[#allocation4 + $0x30] sm:$0xff]   ;;  %v833_v31 = vld [vmem:[#allocation6 + $0x8] sm:$0xff]   ;;  %v835_v33 = vld [vmem:[#allocation6 + $0x18] sm:$0xff]  }
  0x3d   :  { %746 = vmatprep.subr.bf16.mxu0 %v931_v0  ;;  %730 = vmatprep.subr.bf16.mxu1 %v931_v0  ;;  %v834_v32 = vld [vmem:[#allocation6 + $0x10] sm:$0xff]   ;;  %v836_v34 = vld [vmem:[#allocation6 + $0x20] sm:$0xff]   ;;  %v837_v35 = vld [vmem:[#allocation6 + $0x28] sm:$0xff]  }
  0x3e   :  { %v641_v36 = vld [vmem:[%s1165_s4] ss:$0 sm:$0xff]  ;;  %v839_v47 = vld [vmem:[#allocation6 + $0x38] sm:$0xff]   ;;  %v842_v50 = vld [vmem:[%s1170_s9 + $0x10] sm:$0xff]  }
  0x3f   :  { %723 = vmatmul.mubr.msk.bf16.vlgmr.msra.gmra.mrb[0].mxu0 %vm110_vm1, %v815_v4  ;;  %v838_v46 = vld [vmem:[#allocation6 + $0x30] sm:$0xff]   ;;  %v841_v49 = vld [vmem:[%s1170_s9 + $0x8] sm:$0xff]   ;;  %v843_v51 = vld [vmem:[%s1170_s9 + $0x18] sm:$0xff]  }
  0x40   :  { %762 = vmatprep.mubr.msk.bf16.mxu0 %vm932_vm0, %v931_v0  ;;  %731 = vmatpush3.bf16.msra.mxu1 %v818_v6  ;;  %v840_v48 = vld [vmem:[%s1170_s9] sm:$0xff]   ;;  %v845_v53 = vld [vmem:[%s1170_s9 + $0x28] sm:$0xff]   ;;  %v846_v1 = vld [vmem:[%s1170_s9 + $0x30] sm:$0xff]  }
  0x41   :  { %732 = vmatprep.subr.bf16.mxu1 %v931_v0  ;;  %747 = vmatpush3.bf16.msra.mxu0 %v824_v12  ;;  %v844_v52 = vld [vmem:[%s1170_s9 + $0x20] sm:$0xff]   ;;  %v847_v2 = vld [vmem:[%s1170_s9 + $0x38] sm:$0xff]  }
  0x42   :  { %748 = vmatprep.subr.bf16.mxu0 %v931_v0  ;;  %v650_v54 = vld [vmem:[%s1167_s6] ss:$0 sm:$0xff] }
  0x43   :  { %v659_v3 = vld [vmem:[%s1169_s8] ss:$0 sm:$0xff] }
  0x44   :  { %733 = vmatpush3.bf16.msra.mxu1 %v819_v7 }
  0x45   :  { %734 = vmatprep.subr.bf16.mxu1 %v931_v0  ;;  %749 = vmatpush3.bf16.msra.mxu0 %v825_v13 }
  0x46   :  { %750 = vmatprep.subr.bf16.mxu0 %v931_v0 }
  0x48   :  { %735 = vmatpush3.bf16.msra.mxu1 %v820_v8 }
  0x49   :  { %736 = vmatprep.subr.bf16.mxu1 %v931_v0  ;;  %751 = vmatpush3.bf16.msra.mxu0 %v826_v14 }
  0x4a   :  { %752 = vmatprep.subr.bf16.mxu0 %v931_v0 }
  0x4c   :  { %737 = vmatpush3.bf16.msra.mxu1 %v821_v9 }
  0x4d   :  { %738 = vmatprep.subr.bf16.mxu1 %v931_v0  ;;  %753 = vmatpush3.bf16.msra.mxu0 %v827_v15 }
  0x4e   :  { %754 = vmatprep.subr.bf16.mxu0 %v931_v0 }
  0x50   :  { %739 = vmatpush3.bf16.msra.mxu1 %v822_v10 }
  0x51   :  { %740 = vmatprep.subr.bf16.mxu1 %v931_v0  ;;  %755 = vmatpush3.bf16.msra.mxu0 %v828_v16 }
  0x52   :  { %756 = vmatprep.subr.bf16.mxu0 %v931_v0 }
  0x54   :  { %741 = vmatpush3.bf16.msra.mxu1 %v823_v11 }
  0x55   :  { %766 = vmatprep.subr.bf16.mxu1 %v931_v0  ;;  %757 = vmatpush3.bf16.msra.mxu0 %v829_v17 }
  0x56   :  { %758 = vmatprep.subr.bf16.mxu0 %v931_v0 }
  0x59   :  { %759 = vmatpush3.bf16.msra.mxu0 %v830_v28 }
  0x5a   :  { %760 = vmatprep.subr.bf16.mxu0 %v931_v0 }
  0x5d   :  { %761 = vmatpush3.bf16.msra.mxu0 %v831_v29 }
  0x5e   :  { %786 = vmatprep.subr.bf16.mxu0 %v931_v0 }
 0x112   :  { %v148_v19 = vpop.f32.mrb[0].mxu0 }
 0x113   :  { %v149_v20 = vadd.f32 %v636_v18, %v148_v19  ;;  %v724_v21 = vpop.f32.mrb[1].mxu0 }
 0x114   :  { %v151_v22 = vpop.f32.mrb[2].mxu0 }
 0x115   :  { %v152_v23 = vadd.f32 %v636_v18, %v151_v22  ;;  %v725_v24 = vpop.f32.mrb[3].mxu0  ;;  %v155_v25 = vmax.f32 %v149_v20, 0.0 }
 0x117   :  { %v156_v26 = vmax.f32 %v152_v23, 0.0 }
 0x119   :  { %v157_v27 = vpack.c.bf16 %v156_v26, %v155_v25 }
 0x11b   :  { %743 = vmatmul.mubr.bf16.vlgmr.msra.gmra.mrb[0].mxu1 %v157_v27 }
 0x11c   :  { %782 = vmatprep.mubr.msk.bf16.mxu1 %vm932_vm0, %v931_v0  ;;  %767 = vmatpush3.bf16.msra.mxu1 %v832_v30 }
 0x11d   :  { %768 = vmatprep.subr.bf16.mxu1 %v931_v0 }
 0x120   :  { %769 = vmatpush3.bf16.msra.mxu1 %v833_v31 }
 0x121   :  { %770 = vmatprep.subr.bf16.mxu1 %v931_v0 }
 0x124   :  { %771 = vmatpush3.bf16.msra.mxu1 %v834_v32 }
 0x125   :  { %772 = vmatprep.subr.bf16.mxu1 %v931_v0 }
 0x128   :  { %773 = vmatpush3.bf16.msra.mxu1 %v835_v33 }
 0x129   :  { %774 = vmatprep.subr.bf16.mxu1 %v931_v0 }
 0x12c   :  { %775 = vmatpush3.bf16.msra.mxu1 %v836_v34 }
 0x12d   :  { %776 = vmatprep.subr.bf16.mxu1 %v931_v0 }
 0x130   :  { %777 = vmatpush3.bf16.msra.mxu1 %v837_v35 }
 0x131   :  { %778 = vmatprep.subr.bf16.mxu1 %v931_v0 }
 0x134   :  { %779 = vmatpush3.bf16.msra.mxu1 %v838_v46 }
 0x135   :  { %780 = vmatprep.subr.bf16.mxu1 %v931_v0 }
 0x138   :  { %781 = vmatpush3.bf16.msra.mxu1 %v839_v47 }
 0x1ee   :  { %v263_v37 = vpop.f32.mrb[0].mxu1 }
 0x1ef   :  { %v264_v38 = vadd.f32 %v641_v36, %v263_v37  ;;  %v744_v39 = vpop.f32.mrb[1].mxu1 }
 0x1f0   :  { %v266_v40 = vpop.f32.mrb[2].mxu1 }
 0x1f1   :  { %v267_v41 = vadd.f32 %v641_v36, %v266_v40  ;;  %v745_v42 = vpop.f32.mrb[3].mxu1  ;;  %v270_v43 = vmax.f32 %v264_v38, 0.0 }
 0x1f3   :  { %v271_v44 = vmax.f32 %v267_v41, 0.0 }
 0x1f5   :  { %v272_v45 = vpack.c.bf16 %v271_v44, %v270_v43 }
 0x1f7   :  { %763 = vmatmul.mubr.bf16.vlgmr.msra.gmra.mrb[4].mxu0 %v272_v45 }
 0x1f8   :  { %802 = vmatprep.mubr.msk.bf16.mxu0 %vm932_vm0, %v931_v0  ;;  %787 = vmatpush3.bf16.msra.mxu0 %v840_v48 }
 0x1f9   :  { %788 = vmatprep.subr.bf16.mxu0 %v931_v0 }
 0x1fc   :  { %789 = vmatpush3.bf16.msra.mxu0 %v841_v49 }
 0x1fd   :  { %790 = vmatprep.subr.bf16.mxu0 %v931_v0 }
 0x200   :  { %791 = vmatpush3.bf16.msra.mxu0 %v842_v50 }
 0x201   :  { %792 = vmatprep.subr.bf16.mxu0 %v931_v0 }
 0x204   :  { %793 = vmatpush3.bf16.msra.mxu0 %v843_v51 }
 0x205   :  { %794 = vmatprep.subr.bf16.mxu0 %v931_v0 }
 0x208   :  { %795 = vmatpush3.bf16.msra.mxu0 %v844_v52 }
 0x209   :  { %796 = vmatprep.subr.bf16.mxu0 %v931_v0 }
 0x20c   :  { %797 = vmatpush3.bf16.msra.mxu0 %v845_v53 }
 0x20d   :  { %798 = vmatprep.subr.bf16.mxu0 %v931_v0 }
 0x210   :  { %799 = vmatpush3.bf16.msra.mxu0 %v846_v1 }
 0x211   :  { %800 = vmatprep.subr.bf16.mxu0 %v931_v0  ;;  %v668_v0 = vld [vmem:[%s1171_s10] ss:$0 sm:$0xff] }
 0x214   :  { %801 = vmatpush3.bf16.msra.mxu0 %v847_v2 }
 0x2ca   :  { %v378_v55 = vpop.f32.mrb[4].mxu0 }
 0x2cb   :  { %v379_v56 = vadd.f32 %v650_v54, %v378_v55  ;;  %v764_v57 = vpop.f32.mrb[5].mxu0 }
 0x2cc   :  { %v381_v58 = vpop.f32.mrb[6].mxu0 }
 0x2cd   :  { %v382_v59 = vadd.f32 %v650_v54, %v381_v58  ;;  %v765_v60 = vpop.f32.mrb[7].mxu0  ;;  %v385_v61 = vmax.f32 %v379_v56, 0.0 }
 0x2cf   :  { %v386_v62 = vmax.f32 %v382_v59, 0.0 }
 0x2d1   :  { %v387_v63 = vpack.c.bf16 %v386_v62, %v385_v61 }
 0x2d3   :  { %783 = vmatmul.mubr.bf16.vlgmr.msra.gmra.mrb[4].mxu1 %v387_v63 }
 0x3a6   :  { %v493_v4 = vpop.f32.mrb[4].mxu1 }
 0x3a7   :  { %v494_v5 = vadd.f32 %v659_v3, %v493_v4  ;;  %v784_v6 = vpop.f32.mrb[5].mxu1 }
 0x3a8   :  { %v496_v7 = vpop.f32.mrb[6].mxu1 }
 0x3a9   :  { %v497_v8 = vadd.f32 %v659_v3, %v496_v7  ;;  %v785_v9 = vpop.f32.mrb[7].mxu1  ;;  %v500_v10 = vmax.f32 %v494_v5, 0.0 }
 0x3ab   :  { %v501_v11 = vmax.f32 %v497_v8, 0.0 }
 0x3ad   :  { %v502_v12 = vpack.c.bf16 %v501_v11, %v500_v10 }
 0x3af   :  { %803 = vmatmul.mubr.bf16.vlgmr.msra.gmra.mrb[8].mxu0 %v502_v12 }
 0x482   :  { %v608_v13 = vpop.f32.mrb[8].mxu0 }
 0x483   :  { %v609_v14 = vadd.f32 %v668_v0, %v608_v13  ;;  %v804_v15 = vpop.f32.mrb[9].mxu0 }
 0x484   :  { %v611_v16 = vpop.f32.mrb[10].mxu0 }
 0x485   :  { %v677_v17 = vmul.f32 -1.442695, %v609_v14  ;;  %v612_v18 = vadd.f32 %v668_v0, %v611_v16  ;;  %v805_v19 = vpop.f32.mrb[11].mxu0 }
 0x487   :  { %848 = vpow2.f32 %v677_v17  ;;  %v678_v20 = vmul.f32 -1.442695, %v612_v18 }
 0x489   :  { %850 = vpow2.f32 %v678_v20 }
 0x491   :  { %v849_v21 = vpop.eup %848 }
 0x492   :  { %v621_v22 = vadd.f32 1.0, %v849_v21 }
 0x493   :  { %v851_v23 = vpop.eup %850 }
 0x494   :  { %852 = vrcp.f32 %v621_v22  ;;  %v622_v24 = vadd.f32 1.0, %v851_v23 }
 0x496   :  { %854 = vrcp.f32 %v622_v24 }
 0x49e   :  { %v853_v25 = vpop.eup %852 }
 0x49f   :  { %628 = vst.msk [vmem:[%s1172_s11] sm:$0xff] %vm627_vm2, %v853_v25 }
 0x4a0   :  { %v855_v26 = vpop.eup %854 }
 0x4a1   :  { %629 = vst.msk [vmem:[%s1172_s11 + $0x8] sm:$0xff] %vm627_vm2, %v855_v26 }
 0x4a2   :  { %634 = vsyncpa [#allocation3], 1 }
 0x4a3   :  { %635 = vsyncpa [#allocation5], 1 }

// kernel: tpu_custom_call.1
= control target key start
LH: loop header
LB: loop body
LE: loop exit
PB: predicated region body
PF: predicated region fallthrough
CT: control target
= control target key end

     0   :  { %16 = vsyncpa [#allocation3], 0  ;;  %s1161_s0 = inlined_call_operand.vmem [shape: bf16[16,32], index: 0, kind: input, shape index: {}]   ;;  %s1162_s1 = inlined_call_operand.hbm [shape: bf16[32,128], index: 1, kind: input, shape index: {}]   ;;  %s1163_s2 = inlined_call_operand.vmem [shape: f32[1,128], index: 2, kind: input, shape index: {}]   ;;  %s1164_s3 = inlined_call_operand.vmem [shape: bf16[128,128], index: 3, kind: input, shape index: {}]   ;;  %s1165_s4 = inlined_call_operand.vmem [shape: f32[1,128], index: 4, kind: input, shape index: {}]   ;;  %s1166_s5 = inlined_call_operand.hbm [shape: bf16[128,128], index: 5, kind: input, shape index: {}]   ;;  %s1167_s6 = inlined_call_operand.vmem [shape: f32[1,128], index: 6, kind: input, shape index: {}]   ;;  %s1168_s7 = inlined_call_operand.hbm [shape: bf16[128,128], index: 7, kind: input, shape index: {}]   ;;  %s1169_s8 = inlined_call_operand.vmem [shape: f32[1,128], index: 8, kind: input, shape index: {}]   ;;  %s1170_s9 = inlined_call_operand.vmem [shape: bf16[128,8], index: 9, kind: input, shape index: {}]   ;;  %s1171_s10 = inlined_call_operand.vmem [shape: f32[1,8], index: 10, kind: input, shape index: {}]   ;;  %s1172_s11 = inlined_call_operand.vmem [shape: f32[16,8], index: 11, kind: output, shape index: {}]  }
   0x1   :  { %17 = vsyncpa [#allocation5], 0  ;;  %s926_s17 = smov [#allocation4]   ;;  %s927_s19 = smov [#allocation2]  }
   0x2   :  { %s43_s18 = sshll.u32 %s926_s17, 4  ;;  %s25_s20 = sshll.u32 %s927_s19, 4  ;;  %s44_s18 = int_to_ptr.vmem [resolvable:$true] %s43_s18  ;;  %s993_s20 = int_to_ptr.vmem [resolvable:$true] %s25_s20 }
   0x3   :  { %s856_s23 = scalar_lea.hbm %s1166_s5, 1024 }
   0x4   :  { %p857_p0 = scmp.ne.s32.totalorder %s1166_s5, %s856_s23  ;;  %p860_p1 = scmp.lt.u32.totalorder %s856_s23, %s1166_s5 }
   0x6   :  { %p862_p2 = pnand %p860_p1, %p857_p0 }
   0x8   :  { %865 = shalt.err (!%p862_p2)
}
   0x9   :  { %s866_s28 = scalar_lea.vmem %s44_s18, 1024  ;;  %p871_p4 = scmp.lt.s32.totalorder %s44_s18, %s44_s18 }
   0xa   :  { %p867_p3 = scmp.ne.s32.totalorder %s44_s18, %s866_s28  ;;  %p872_p5 = scmp.lt.s32.totalorder %s866_s28, %s866_s28 }
   0xc   :  { %p873_p6 = por %p872_p5, %p871_p4 }
   0xe   :  { %p874_p7 = pnand %p873_p6, %p867_p3 }
  0x10   :  { %877 = shalt.err (!%p874_p7)
}
  0x11   :  { %s928_s29 = smov 64   ;;  %s929_s30 = smov 4  }
  0x12   :  { %49 = dma.hbm_to_vmem [thread:$0]  %s1166_s5, 1024, %s44_s18, [#allocation5], %s928_s29, %s928_s29, %s929_s30  }
  0x13   :  { %s878_s16 = scalar_lea.hbm %s1162_s1, 256 }
  0x14   :  { %p879_p8 = scmp.ne.s32.totalorder %s1162_s1, %s878_s16  ;;  %p882_p9 = scmp.lt.u32.totalorder %s878_s16, %s1162_s1 }
  0x16   :  { %p884_p10 = pnand %p882_p9, %p879_p8 }
  0x18   :  { %887 = shalt.err (!%p884_p10)
}
  0x19   :  { %s888_s23 = scalar_lea.vmem %s993_s20, 256  ;;  %p893_p12 = scmp.lt.s32.totalorder %s993_s20, %s993_s20 }
  0x1a   :  { %p889_p11 = scmp.ne.s32.totalorder %s993_s20, %s888_s23  ;;  %p894_p13 = scmp.lt.s32.totalorder %s888_s23, %s888_s23 }
  0x1c   :  { %p895_p0 = por %p894_p13, %p893_p12 }
  0x1e   :  { %p896_p1 = pnand %p895_p0, %p889_p11 }
  0x20   :  { %899 = shalt.err (!%p896_p1)
}
  0x21   :  { %31 = dma.hbm_to_vmem [thread:$0]  %s1162_s1, 256, %s993_s20, [#allocation3], %s928_s29, %s928_s29, %s929_s30  }
  0x22   :  { %s930_s24 = smov [#allocation6]   ;;  %s900_s28 = scalar_lea.hbm %s1168_s7, 1024 }
  0x23   :  { %s57_s25 = sshll.u32 %s930_s24, 4  ;;  %p901_p2 = scmp.ne.s32.totalorder %s1168_s7, %s900_s28  ;;  %s58_s25 = int_to_ptr.vmem [resolvable:$true] %s57_s25 }
  0x24   :  { %p904_p3 = scmp.lt.u32.totalorder %s900_s28, %s1168_s7 }
  0x26   :  { %p906_p4 = pnand %p904_p3, %p901_p2 }
  0x28   :  { %909 = shalt.err (!%p906_p4)
}
  0x29   :  { %s910_s16 = scalar_lea.vmem %s58_s25, 1024  ;;  %p915_p6 = scmp.lt.s32.totalorder %s58_s25, %s58_s25 }
  0x2a   :  { %p911_p5 = scmp.ne.s32.totalorder %s58_s25, %s910_s16  ;;  %p916_p7 = scmp.lt.s32.totalorder %s910_s16, %s910_s16 }
  0x2c   :  { %p917_p8 = por %p916_p7, %p915_p6 }
  0x2e   :  { %p918_p9 = pnand %p917_p8, %p911_p5 }
  0x30   :  { %921 = shalt.err (!%p918_p9)
}
  0x31   :  { %63 = dma.hbm_to_vmem [thread:$0]  %s1168_s7, 1024, %s58_s25, [#allocation5], %s928_s29, %s928_s29, %s929_s30  }
  0x32   :  { %922 = dma.done.wait [#allocation3], 256  }
  0x33   :  { %923 = vsyncadd [#allocation3], 4294967040 }
  0x34   :  { %924 = dma.done.wait [#allocation5], 2048  }
  0x35   :  { %925 = vsyncadd [#allocation5], 4294965248  ;;  %v931_v0 = vmov 0.0   ;;  %vm932_vm0 = vmmov 0   ;;  %v813_v1 = vld [vmem:[#allocation2] sm:$0xff]   ;;  %v814_v2 = vld [vmem:[#allocation2 + $0x8] sm:$0xff]  }
  0x36   :  { %718 = vmatprep.subr.bf16.mxu0 %v931_v0  ;;  %722 = vmatprep.mubr.msk.bf16.mxu0 %vm932_vm0, %v931_v0  ;;  %v816_v3 = vld [vmem:[%s1164_s3] sm:$0xff]   ;;  %v817_v5 = vld [vmem:[%s1164_s3 + $0x8] sm:$0xff]   ;;  %vm110_vm1 = vcmask 261120   ;;  %v818_v6 = vld [vmem:[%s1164_s3 + $0x10] sm:$0xff]   ;;  %vm627_vm2 = vcmask 64512  }
  0x37   :  { %726 = vmatprep.subr.bf16.mxu1 %v931_v0  ;;  %742 = vmatprep.mubr.msk.bf16.mxu1 %vm932_vm0, %v931_v0  ;;  %v815_v4 = vld [vmem:[%s1161_s0] sm:$0xff]   ;;  %v819_v7 = vld [vmem:[%s1164_s3 + $0x18] sm:$0xff]   ;;  %v821_v9 = vld [vmem:[%s1164_s3 + $0x28] sm:$0xff]  }
  0x38   :  { %719 = vmatpush3.bf16.msra.mxu0 %v813_v1  ;;  %727 = vmatpush3.bf16.msra.mxu1 %v816_v3  ;;  %v820_v8 = vld [vmem:[%s1164_s3 + $0x20] sm:$0xff]   ;;  %v822_v10 = vld [vmem:[%s1164_s3 + $0x30] sm:$0xff]   ;;  %v823_v11 = vld [vmem:[%s1164_s3 + $0x38] sm:$0xff]  }
  0x39   :  { %720 = vmatprep.subr.bf16.mxu0 %v931_v0  ;;  %728 = vmatprep.subr.bf16.mxu1 %v931_v0  ;;  %v824_v12 = vld [vmem:[#allocation4] sm:$0xff]   ;;  %v825_v13 = vld [vmem:[#allocation4 + $0x8] sm:$0xff]   ;;  %v826_v14 = vld [vmem:[#allocation4 + $0x10] sm:$0xff]  }
  0x3a   :  { %v827_v15 = vld [vmem:[#allocation4 + $0x18] sm:$0xff]   ;;  %v828_v16 = vld [vmem:[#allocation4 + $0x20] sm:$0xff]   ;;  %v829_v17 = vld [vmem:[#allocation4 + $0x28] sm:$0xff]  }
  0x3b   :  { %v636_v18 = vld [vmem:[%s1163_s2] ss:$0 sm:$0xff]  ;;  %v831_v29 = vld [vmem:[#allocation4 + $0x38] sm:$0xff]   ;;  %v832_v30 = vld [vmem:[#allocation6] sm:$0xff]  }
  0x3c   :  { %721 = vmatpush3.bf16.msra.mxu0 %v814_v2  ;;  %729 = vmatpush3.bf16.msra.mxu1 %v817_v5  ;;  %v830_v28 = vld [vmem:[#allocation4 + $0x30] sm:$0xff]   ;;  %v833_v31 = vld [vmem:[#allocation6 + $0x8] sm:$0xff]   ;;  %v835_v33 = vld [vmem:[#allocation6 + $0x18] sm:$0xff]  }
  0x3d   :  { %746 = vmatprep.subr.bf16.mxu0 %v931_v0  ;;  %730 = vmatprep.subr.bf16.mxu1 %v931_v0  ;;  %v834_v32 = vld [vmem:[#allocation6 + $0x10] sm:$0xff]   ;;  %v836_v34 = vld [vmem:[#allocation6 + $0x20] sm:$0xff]   ;;  %v837_v35 = vld [vmem:[#allocation6 + $0x28] sm:$0xff]  }
  0x3e   :  { %v641_v36 = vld [vmem:[%s1165_s4] ss:$0 sm:$0xff]  ;;  %v839_v47 = vld [vmem:[#allocation6 + $0x38] sm:$0xff]   ;;  %v842_v50 = vld [vmem:[%s1170_s9 + $0x10] sm:$0xff]  }
  0x3f   :  { %723 = vmatmul.mubr.msk.bf16.vlgmr.msra.gmra.mrb[0].mxu0 %vm110_vm1, %v815_v4  ;;  %v838_v46 = vld [vmem:[#allocation6 + $0x30] sm:$0xff]   ;;  %v841_v49 = vld [vmem:[%s1170_s9 + $0x8] sm:$0xff]   ;;  %v843_v51 = vld [vmem:[%s1170_s9 + $0x18] sm:$0xff]  }
  0x40   :  { %762 = vmatprep.mubr.msk.bf16.mxu0 %vm932_vm0, %v931_v0  ;;  %731 = vmatpush3.bf16.msra.mxu1 %v818_v6  ;;  %v840_v48 = vld [vmem:[%s1170_s9] sm:$0xff]   ;;  %v845_v53 = vld [vmem:[%s1170_s9 + $0x28] sm:$0xff]   ;;  %v846_v1 = vld [vmem:[%s1170_s9 + $0x30] sm:$0xff]  }
  0x41   :  { %732 = vmatprep.subr.bf16.mxu1 %v931_v0  ;;  %747 = vmatpush3.bf16.msra.mxu0 %v824_v12  ;;  %v844_v52 = vld [vmem:[%s1170_s9 + $0x20] sm:$0xff]   ;;  %v847_v2 = vld [vmem:[%s1170_s9 + $0x38] sm:$0xff]  }
  0x42   :  { %748 = vmatprep.subr.bf16.mxu0 %v931_v0  ;;  %v650_v54 = vld [vmem:[%s1167_s6] ss:$0 sm:$0xff] }
  0x43   :  { %v659_v3 = vld [vmem:[%s1169_s8] ss:$0 sm:$0xff] }
  0x44   :  { %733 = vmatpush3.bf16.msra.mxu1 %v819_v7 }
  0x45   :  { %734 = vmatprep.subr.bf16.mxu1 %v931_v0  ;;  %749 = vmatpush3.bf16.msra.mxu0 %v825_v13 }
  0x46   :  { %750 = vmatprep.subr.bf16.mxu0 %v931_v0 }
  0x48   :  { %735 = vmatpush3.bf16.msra.mxu1 %v820_v8 }
  0x49   :  { %736 = vmatprep.subr.bf16.mxu1 %v931_v0  ;;  %751 = vmatpush3.bf16.msra.mxu0 %v826_v14 }
  0x4a   :  { %752 = vmatprep.subr.bf16.mxu0 %v931_v0 }
  0x4c   :  { %737 = vmatpush3.bf16.msra.mxu1 %v821_v9 }
  0x4d   :  { %738 = vmatprep.subr.bf16.mxu1 %v931_v0  ;;  %753 = vmatpush3.bf16.msra.mxu0 %v827_v15 }
  0x4e   :  { %754 = vmatprep.subr.bf16.mxu0 %v931_v0 }
  0x50   :  { %739 = vmatpush3.bf16.msra.mxu1 %v822_v10 }
  0x51   :  { %740 = vmatprep.subr.bf16.mxu1 %v931_v0  ;;  %755 = vmatpush3.bf16.msra.mxu0 %v828_v16 }
  0x52   :  { %756 = vmatprep.subr.bf16.mxu0 %v931_v0 }
  0x54   :  { %741 = vmatpush3.bf16.msra.mxu1 %v823_v11 }
  0x55   :  { %766 = vmatprep.subr.bf16.mxu1 %v931_v0  ;;  %757 = vmatpush3.bf16.msra.mxu0 %v829_v17 }
  0x56   :  { %758 = vmatprep.subr.bf16.mxu0 %v931_v0 }
  0x59   :  { %759 = vmatpush3.bf16.msra.mxu0 %v830_v28 }
  0x5a   :  { %760 = vmatprep.subr.bf16.mxu0 %v931_v0 }
  0x5d   :  { %761 = vmatpush3.bf16.msra.mxu0 %v831_v29 }
  0x5e   :  { %786 = vmatprep.subr.bf16.mxu0 %v931_v0 }
 0x112   :  { %v148_v19 = vpop.f32.mrb[0].mxu0 }
 0x113   :  { %v149_v20 = vadd.f32 %v636_v18, %v148_v19  ;;  %v724_v21 = vpop.f32.mrb[1].mxu0 }
 0x114   :  { %v151_v22 = vpop.f32.mrb[2].mxu0 }
 0x115   :  { %v152_v23 = vadd.f32 %v636_v18, %v151_v22  ;;  %v725_v24 = vpop.f32.mrb[3].mxu0  ;;  %v155_v25 = vmax.f32 %v149_v20, 0.0 }
 0x117   :  { %v156_v26 = vmax.f32 %v152_v23, 0.0 }
 0x119   :  { %v157_v27 = vpack.c.bf16 %v156_v26, %v155_v25 }
 0x11b   :  { %743 = vmatmul.mubr.bf16.vlgmr.msra.gmra.mrb[0].mxu1 %v157_v27 }
 0x11c   :  { %782 = vmatprep.mubr.msk.bf16.mxu1 %vm932_vm0, %v931_v0  ;;  %767 = vmatpush3.bf16.msra.mxu1 %v832_v30 }
 0x11d   :  { %768 = vmatprep.subr.bf16.mxu1 %v931_v0 }
 0x120   :  { %769 = vmatpush3.bf16.msra.mxu1 %v833_v31 }
 0x121   :  { %770 = vmatprep.subr.bf16.mxu1 %v931_v0 }
 0x124   :  { %771 = vmatpush3.bf16.msra.mxu1 %v834_v32 }
 0x125   :  { %772 = vmatprep.subr.bf16.mxu1 %v931_v0 }
 0x128   :  { %773 = vmatpush3.bf16.msra.mxu1 %v835_v33 }
 0x129   :  { %774 = vmatprep.subr.bf16.mxu1 %v931_v0 }
 0x12c   :  { %775 = vmatpush3.bf16.msra.mxu1 %v836_v34 }
 0x12d   :  { %776 = vmatprep.subr.bf16.mxu1 %v931_v0 }
 0x130   :  { %777 = vmatpush3.bf16.msra.mxu1 %v837_v35 }
 0x131   :  { %778 = vmatprep.subr.bf16.mxu1 %v931_v0 }
 0x134   :  { %779 = vmatpush3.bf16.msra.mxu1 %v838_v46 }
 0x135   :  { %780 = vmatprep.subr.bf16.mxu1 %v931_v0 }
 0x138   :  { %781 = vmatpush3.bf16.msra.mxu1 %v839_v47 }
 0x1ee   :  { %v263_v37 = vpop.f32.mrb[0].mxu1 }
 0x1ef   :  { %v264_v38 = vadd.f32 %v641_v36, %v263_v37  ;;  %v744_v39 = vpop.f32.mrb[1].mxu1 }
 0x1f0   :  { %v266_v40 = vpop.f32.mrb[2].mxu1 }
 0x1f1   :  { %v267_v41 = vadd.f32 %v641_v36, %v266_v40  ;;  %v745_v42 = vpop.f32.mrb[3].mxu1  ;;  %v270_v43 = vmax.f32 %v264_v38, 0.0 }
 0x1f3   :  { %v271_v44 = vmax.f32 %v267_v41, 0.0 }
 0x1f5   :  { %v272_v45 = vpack.c.bf16 %v271_v44, %v270_v43 }
 0x1f7   :  { %763 = vmatmul.mubr.bf16.vlgmr.msra.gmra.mrb[4].mxu0 %v272_v45 }
 0x1f8   :  { %802 = vmatprep.mubr.msk.bf16.mxu0 %vm932_vm0, %v931_v0  ;;  %787 = vmatpush3.bf16.msra.mxu0 %v840_v48 }
 0x1f9   :  { %788 = vmatprep.subr.bf16.mxu0 %v931_v0 }
 0x1fc   :  { %789 = vmatpush3.bf16.msra.mxu0 %v841_v49 }
 0x1fd   :  { %790 = vmatprep.subr.bf16.mxu0 %v931_v0 }
 0x200   :  { %791 = vmatpush3.bf16.msra.mxu0 %v842_v50 }
 0x201   :  { %792 = vmatprep.subr.bf16.mxu0 %v931_v0 }
 0x204   :  { %793 = vmatpush3.bf16.msra.mxu0 %v843_v51 }
 0x205   :  { %794 = vmatprep.subr.bf16.mxu0 %v931_v0 }
 0x208   :  { %795 = vmatpush3.bf16.msra.mxu0 %v844_v52 }
 0x209   :  { %796 = vmatprep.subr.bf16.mxu0 %v931_v0 }
 0x20c   :  { %797 = vmatpush3.bf16.msra.mxu0 %v845_v53 }
 0x20d   :  { %798 = vmatprep.subr.bf16.mxu0 %v931_v0 }
 0x210   :  { %799 = vmatpush3.bf16.msra.mxu0 %v846_v1 }
 0x211   :  { %800 = vmatprep.subr.bf16.mxu0 %v931_v0  ;;  %v668_v0 = vld [vmem:[%s1171_s10] ss:$0 sm:$0xff] }
 0x214   :  { %801 = vmatpush3.bf16.msra.mxu0 %v847_v2 }
 0x2ca   :  { %v378_v55 = vpop.f32.mrb[4].mxu0 }
 0x2cb   :  { %v379_v56 = vadd.f32 %v650_v54, %v378_v55  ;;  %v764_v57 = vpop.f32.mrb[5].mxu0 }
 0x2cc   :  { %v381_v58 = vpop.f32.mrb[6].mxu0 }
 0x2cd   :  { %v382_v59 = vadd.f32 %v650_v54, %v381_v58  ;;  %v765_v60 = vpop.f32.mrb[7].mxu0  ;;  %v385_v61 = vmax.f32 %v379_v56, 0.0 }
 0x2cf   :  { %v386_v62 = vmax.f32 %v382_v59, 0.0 }
 0x2d1   :  { %v387_v63 = vpack.c.bf16 %v386_v62, %v385_v61 }
 0x2d3   :  { %783 = vmatmul.mubr.bf16.vlgmr.msra.gmra.mrb[4].mxu1 %v387_v63 }
 0x3a6   :  { %v493_v4 = vpop.f32.mrb[4].mxu1 }
 0x3a7   :  { %v494_v5 = vadd.f32 %v659_v3, %v493_v4  ;;  %v784_v6 = vpop.f32.mrb[5].mxu1 }
 0x3a8   :  { %v496_v7 = vpop.f32.mrb[6].mxu1 }
 0x3a9   :  { %v497_v8 = vadd.f32 %v659_v3, %v496_v7  ;;  %v785_v9 = vpop.f32.mrb[7].mxu1  ;;  %v500_v10 = vmax.f32 %v494_v5, 0.0 }
 0x3ab   :  { %v501_v11 = vmax.f32 %v497_v8, 0.0 }
 0x3ad   :  { %v502_v12 = vpack.c.bf16 %v501_v11, %v500_v10 }
 0x3af   :  { %803 = vmatmul.mubr.bf16.vlgmr.msra.gmra.mrb[8].mxu0 %v502_v12 }
 0x482   :  { %v608_v13 = vpop.f32.mrb[8].mxu0 }
 0x483   :  { %v609_v14 = vadd.f32 %v668_v0, %v608_v13  ;;  %v804_v15 = vpop.f32.mrb[9].mxu0 }
 0x484   :  { %v611_v16 = vpop.f32.mrb[10].mxu0 }
 0x485   :  { %v677_v17 = vmul.f32 -1.442695, %v609_v14  ;;  %v612_v18 = vadd.f32 %v668_v0, %v611_v16  ;;  %v805_v19 = vpop.f32.mrb[11].mxu0 }
 0x487   :  { %848 = vpow2.f32 %v677_v17  ;;  %v678_v20 = vmul.f32 -1.442695, %v612_v18 }
 0x489   :  { %850 = vpow2.f32 %v678_v20 }
 0x491   :  { %v849_v21 = vpop.eup %848 }
 0x492   :  { %v621_v22 = vadd.f32 1.0, %v849_v21 }
 0x493   :  { %v851_v23 = vpop.eup %850 }
 0x494   :  { %852 = vrcp.f32 %v621_v22  ;;  %v622_v24 = vadd.f32 1.0, %v851_v23 }
 0x496   :  { %854 = vrcp.f32 %v622_v24 }
 0x49e   :  { %v853_v25 = vpop.eup %852 }
 0x49f   :  { %628 = vst.msk [vmem:[%s1172_s11] sm:$0xff] %vm627_vm2, %v853_v25 }
 0x4a0   :  { %v855_v26 = vpop.eup %854 }
 0x4a1   :  { %629 = vst.msk [vmem:[%s1172_s11 + $0x8] sm:$0xff] %vm627_vm2, %v855_v26 }
 0x4a2   :  { %634 = vsyncpa [#allocation3], 1 }
 0x4a3   :  { %635 = vsyncpa [#allocation5], 1 }

</bundles_post_ra>
